<compile_context>
chip_gen: v7x
topology: tpu7x:2x2x1
jax: 0.10.0
libtpu: 0.0.40
codegen_flags: <defaults>
</compile_context>

<pallas_src>
import functools

import jax
import jax.numpy as jnp
from jax import lax
from jax.experimental import pallas as pl
from jax.experimental.pallas import tpu as pltpu

LANE = 128


def _nll_surv_kernel(*refs, alpha, eps, has_s, tiles_per_shard):
    if has_s:
        nvalid_ref, hz_ref, s_ref, y_ref, c_ref, out_ref, acc_ref = refs
    else:
        nvalid_ref, hz_ref, y_ref, c_ref, out_ref, acc_ref = refs
        s_ref = None

    p = pl.program_id(0)          # shard (parallel axis; megacore on v7x)
    i = pl.program_id(1)          # batch tile within the shard

    hz = hz_ref[...].astype(jnp.float32)          # [K, TB]
    y = y_ref[...]                                # [1, TB] int32 labels
    c = c_ref[...].astype(jnp.float32)            # [1, TB] censoring indicator
    K, TB = hz.shape

    kidx = lax.broadcasted_iota(jnp.int32, (K, TB), 0)       # bin index
    onehot_y = kidx == y
    zeros = jnp.zeros_like(hz)

    # hazards[Y] : one-hot gather over the tiny K (sublane) axis
    h_y = jnp.sum(jnp.where(onehot_y, hz, zeros), axis=0, keepdims=True)

    if has_s:
        s = s_ref[...].astype(jnp.float32)        # [K, TB]
        s_y = jnp.sum(jnp.where(onehot_y, s, zeros), axis=0, keepdims=True)
        s_ym1 = jnp.sum(jnp.where(kidx == (y - 1), s, zeros),
                        axis=0, keepdims=True)
        # S_padded = cat([ones, S], 1);  S_padded[Y] = 1 if Y==0 else S[Y-1]
        s_pad_y = jnp.where(y == 0, jnp.ones_like(s_ym1), s_ym1)
    else:
        # S = cumprod(1 - hazards); only the two gathered values are needed:
        #   S_padded[Y]   = prod_{k <  Y} (1 - hz[k])   (== 1 for Y == 0)
        #   S_padded[Y+1] = S[Y] = S_padded[Y] * (1 - hz[Y])
        factors = jnp.where(kidx < y, 1.0 - hz, jnp.ones_like(hz))   # [K, TB]
        prod = factors[0:1, :]
        for k in range(1, K):             # K tiny & static -> unrolled
            prod = prod * factors[k:k + 1, :]
        s_pad_y = prod
        s_y = s_pad_y * (1.0 - h_y)

    # exact PyTorch formula: two clamped logs (EUP slot; not a bottleneck)
    log_unc = (jnp.log(jnp.maximum(s_pad_y, eps)) +
               jnp.log(jnp.maximum(h_y, eps)))
    log_cen = jnp.log(jnp.maximum(s_y, eps))

    uncensored = -(1.0 - c) * log_unc             # [1, TB]
    censored = -c * log_cen                       # [1, TB]
    neg_l = censored + uncensored
    loss_vec = (1.0 - alpha) * neg_l + alpha * uncensored

    # Mask padded / redundant lanes.  `t` is the UNclamped global tile index,
    # so both the ragged last tile and any clamped duplicate tiles assigned to
    # the second shard contribute exactly zero (where selects, so garbage /
    # NaN lanes cannot leak into the sum).
    n_valid = nvalid_ref[0]
    t = p * tiles_per_shard + i
    lane = lax.broadcasted_iota(jnp.int32, (1, TB), 1)
    gcol = t * TB + lane
    loss_vec = jnp.where(gcol < n_valid, loss_vec, jnp.zeros_like(loss_vec))

    @pl.when(i == 0)
    def _():
        acc_ref[...] = jnp.zeros_like(acc_ref)

    # Pure VPU vector accumulate: no loop-carried cross-lane reduce.
    acc_ref[...] += loss_vec

    @pl.when(i == pl.num_programs(1) - 1)
    def _():
        total = jnp.sum(acc_ref[...])             # single XLU reduce per shard
        out_lane = lax.broadcasted_iota(jnp.int32, out_ref.shape, 1)
        out_ref[...] = jnp.where(out_lane == 0, total, 0.0)


def _round_up(x, m):
    return ((x + m - 1) // m) * m


def _pick_batch_tile(B, K, hz_dtype, s_dtype):
    """Size the batch tile (lanes) from a conservative VMEM budget that fits
    the smallest default scoped-VMEM limit (v5e: 16 MiB)."""
    budget = 12 * 1024 * 1024

    def per_lane_bytes(k, dtype):
        itemsize = jnp.dtype(dtype).itemsize
        pack = max(1, 4 // itemsize)
        k_pad = _round_up(max(k, 1), 8 * pack)    # sublane padding
        return k_pad * itemsize

    per_lane = 2 * per_lane_bytes(K, hz_dtype)            # hazards, double-buffered
    if s_dtype is not None:
        per_lane += 2 * per_lane_bytes(K, s_dtype)        # S, double-buffered
    per_lane += 2 * 8 * 4                                 # Y row (int32)
    per_lane += 2 * 8 * 4                                 # c row (f32)
    per_lane += 8 * 4                                     # accumulator scratch

    tb = (budget // per_lane) // LANE * LANE
    tb = max(LANE, min(tb, 32768))
    return min(tb, _round_up(B, LANE))


def nll_surv_loss_pallas(hazards, S, Y, c, alpha=0.15, eps=1e-7,
                         batch_tile=None):
    """Pallas implementation of nll_loss(hazards, S, Y, c, alpha, eps)."""
    hazards = jnp.asarray(hazards)
    B, K = hazards.shape
    has_s = S is not None

    if batch_tile is None:
        tb = _pick_batch_tile(B, K, hazards.dtype,
                              jnp.asarray(S).dtype if has_s else None)
    else:
        tb = max(LANE, (int(batch_tile) // LANE) * LANE)
        tb = min(tb, _round_up(B, LANE))

    num_tiles = pl.cdiv(B, tb)
    num_shards = 2 if num_tiles >= 2 else 1   # >1 only pays off on multi-TC (v7x)
    tiles_per_shard = pl.cdiv(num_tiles, num_shards)
    last_blk = num_tiles - 1

    # Single layout pass (transpose only; no pad / upcast copies).
    hz_t = hazards.T                                            # [K, B], native dtype
    y_row = jnp.asarray(Y).reshape(1, -1).astype(jnp.int32)     # [1, B]
    c_row = jnp.asarray(c).reshape(1, -1).astype(jnp.float32)   # [1, B]
    n_valid = jnp.array([B], dtype=jnp.int32)                   # scalar-prefetch

    def data_map(p, i, n_valid_ref):
        # Clamp so redundant tiles of the last shard stay in-bounds; they are
        # zeroed by the in-kernel mask (which uses the UNclamped index).
        return (0, jnp.minimum(p * tiles_per_shard + i, last_blk))

    in_specs = [pl.BlockSpec((K, tb), data_map)]
    inputs = [hz_t]
    if has_s:
        in_specs.append(pl.BlockSpec((K, tb), data_map))
        inputs.append(jnp.asarray(S).T)                         # native dtype
    in_specs += [pl.BlockSpec((1, tb), data_map),
                 pl.BlockSpec((1, tb), data_map)]
    inputs += [y_row, c_row]

    kernel = functools.partial(_nll_surv_kernel, alpha=float(alpha),
                               eps=float(eps), has_s=has_s,
                               tiles_per_shard=tiles_per_shard)

    partials = pl.pallas_call(
        kernel,
        out_shape=jax.ShapeDtypeStruct((1, num_shards * LANE), jnp.float32),
        grid_spec=pltpu.PrefetchScalarGridSpec(
            num_scalar_prefetch=1,
            grid=(num_shards, tiles_per_shard),
            in_specs=in_specs,
            out_specs=pl.BlockSpec((1, LANE), lambda p, i, n: (0, p)),
            scratch_shapes=[pltpu.VMEM((1, tb), jnp.float32)]),
        compiler_params=pltpu.CompilerParams(
            # shard axis may run on separate TensorCores (v7x megacore);
            # the tile axis carries the accumulator -> "arbitrary".
            dimension_semantics=("parallel", "arbitrary")),
    )(n_valid, *inputs)

    # Tiny epilogue outside the kernel: sum of <=256 floats + mean scale.
    return jnp.sum(partials) / B


class NLLSurvLossPallas:
    """Mirror of the PyTorch NLLSurvLoss module (forward only)."""

    def __init__(self, alpha=0.15):
        self.alpha = alpha

    def __call__(self, hazards, surv, surv_label, c):
        return nll_surv_loss_pallas(hazards, surv, surv_label, c,
                                    alpha=self.alpha)


def _reference(hazards, S, Y, c, alpha=0.15, eps=1e-7):
    # plain-JAX reference of the PyTorch nll_loss for sanity checking
    B = Y.shape[0]
    Y = Y.reshape(B, 1).astype(jnp.int32)
    c = c.reshape(B, 1).astype(jnp.float32)
    if S is None:
        S = jnp.cumprod(1.0 - hazards, axis=1)
    S_padded = jnp.concatenate([jnp.ones_like(c), S], axis=1)
    g = lambda a, idx: jnp.take_along_axis(a, idx, axis=1)
    unc = -(1 - c) * (jnp.log(jnp.maximum(g(S_padded, Y), eps)) +
                      jnp.log(jnp.maximum(g(hazards, Y), eps)))
    cen = -c * jnp.log(jnp.maximum(g(S_padded, Y + 1), eps))
    neg_l = cen + unc
    loss = (1 - alpha) * neg_l + alpha * unc
    return jnp.mean(loss)


if __name__ == "__main__":
    key = jax.random.PRNGKey(0)
    B, K = 8, 4  # batch=8, 4 survival bins

    k1, k2, k3 = jax.random.split(key, 3)
    logits = jax.random.normal(k1, (B, K), dtype=jnp.float32)
    hazards = jax.nn.sigmoid(logits)                             # hazards in (0, 1)
    S = jnp.cumprod(1.0 - hazards, axis=1)                       # survival curve
    Y = jax.random.randint(k2, (B,), 0, K, dtype=jnp.int32)      # surv_label
    c = jax.random.bernoulli(k3, 0.3, (B,)).astype(jnp.float32)  # censoring

    loss_fn = NLLSurvLossPallas(alpha=0.15)
    ref = jax.block_until_ready(_reference(hazards, S, Y, c, alpha=0.15))

    # path 1: S provided (matches the module's outputs.surv usage)
    loss_with_s = jax.block_until_ready(loss_fn(hazards, S, Y, c))
    assert jnp.allclose(loss_with_s, ref, atol=1e-5, rtol=1e-5), (loss_with_s, ref)

    # path 2: S=None -> S derived in-kernel from hazards only
    loss_no_s = jax.block_until_ready(
        nll_surv_loss_pallas(hazards, None, Y, c, alpha=0.15))
    assert jnp.allclose(loss_no_s, ref, atol=1e-5, rtol=1e-5), (loss_no_s, ref)

    # path 3: bf16 streams (no wrapper upcast; cast happens inside the kernel)
    hz_bf = hazards.astype(jnp.bfloat16)
    s_bf = S.astype(jnp.bfloat16)
    loss_bf = jax.block_until_ready(
        nll_surv_loss_pallas(hz_bf, s_bf, Y, c, alpha=0.15))
    ref_bf = _reference(hz_bf.astype(jnp.float32), s_bf.astype(jnp.float32),
                        Y, c, alpha=0.15)
    assert jnp.allclose(loss_bf, ref_bf, atol=1e-5, rtol=1e-5), (loss_bf, ref_bf)

    # path 4: ragged multi-tile batch -> exercises both shards, the clamped
    # redundant tile, and the ragged-last-tile lane mask (batch_tile forced small)
    B2 = 300
    k4, k5, k6 = jax.random.split(jax.random.PRNGKey(1), 3)
    hz2 = jax.nn.sigmoid(jax.random.normal(k4, (B2, K), dtype=jnp.float32))
    S2 = jnp.cumprod(1.0 - hz2, axis=1)
    Y2 = jax.random.randint(k5, (B2,), 0, K, dtype=jnp.int32)
    c2 = jax.random.bernoulli(k6, 0.3, (B2,)).astype(jnp.float32)
    loss2 = jax.block_until_ready(
        nll_surv_loss_pallas(hz2, S2, Y2, c2, alpha=0.15, batch_tile=128))
    ref2 = _reference(hz2, S2, Y2, c2, alpha=0.15)
    assert jnp.allclose(loss2, ref2, atol=1e-5, rtol=1e-4), (loss2, ref2)

    print("KERNEL_OK")
</pallas_src>

<mosaic_0001>
module attributes {stable_mosaic.version = 11 : i64} {
  func.func @_nll_surv_kernel(%arg0: i32, %arg1: i32, %arg2: memref<1xi32, #tpu.memory_space<smem>>, %arg3: memref<4x128xf32, #tpu.memory_space<vmem>>, %arg4: memref<4x128xf32, #tpu.memory_space<vmem>>, %arg5: memref<1x128xi32, #tpu.memory_space<vmem>>, %arg6: memref<1x128xf32, #tpu.memory_space<vmem>>, %arg7: memref<1x128xf32, #tpu.memory_space<vmem>>, %arg8: memref<1x128xf32, #tpu.memory_space<vmem>>) attributes {dimension_semantics = [#tpu.dimension_semantics<parallel>, #tpu.dimension_semantics<arbitrary>], iteration_bounds = array<i64: 1, 1>, scalar_prefetch = 1 : i64, scratch_operands = 1 : i64, tpu.core_type = #tpu.core_type<tc>, window_params = [{transform_indices = @transform_0, window_bounds = array<i64: 4, 128>}, {transform_indices = @transform_1, window_bounds = array<i64: 4, 128>}, {transform_indices = @transform_2, window_bounds = array<i64: 1, 128>}, {transform_indices = @transform_3, window_bounds = array<i64: 1, 128>}, {transform_indices = @transform_4, window_bounds = array<i64: 1, 128>}]} {
    %c0 = arith.constant 0 : index
    %c0_0 = arith.constant 0 : index
    %0 = vector.load %arg3[%c0, %c0_0] : memref<4x128xf32, #tpu.memory_space<vmem>>, vector<4x128xf32>
    %c0_1 = arith.constant 0 : index
    %c0_2 = arith.constant 0 : index
    %1 = vector.load %arg5[%c0_1, %c0_2] : memref<1x128xi32, #tpu.memory_space<vmem>>, vector<1x128xi32>
    %c0_3 = arith.constant 0 : index
    %c0_4 = arith.constant 0 : index
    %2 = vector.load %arg6[%c0_3, %c0_4] : memref<1x128xf32, #tpu.memory_space<vmem>>, vector<1x128xf32>
    %3 = tpu.iota {dimensions = array<i32: 0>} : vector<4x128xi32>
    %4 = vector.broadcast %1 : vector<1x128xi32> to vector<4x128xi32>
    %5 = arith.cmpi eq, %3, %4 : vector<4x128xi32>
    %cst = arith.constant 0.000000e+00 : f32
    %6 = vector.broadcast %cst : f32 to vector<4x128xf32>
    %7 = arith.select %5, %0, %6 : vector<4x128xi1>, vector<4x128xf32>
    %cst_5 = arith.constant dense<0.000000e+00> : vector<128xf32>
    %8 = vector.multi_reduction <add>, %7, %cst_5 [0] : vector<4x128xf32> to vector<128xf32>
    %9 = vector.shape_cast %8 : vector<128xf32> to vector<1x128xf32>
    %c0_6 = arith.constant 0 : index
    %c0_7 = arith.constant 0 : index
    %10 = vector.load %arg4[%c0_6, %c0_7] : memref<4x128xf32, #tpu.memory_space<vmem>>, vector<4x128xf32>
    %11 = arith.select %5, %10, %6 : vector<4x128xi1>, vector<4x128xf32>
    %cst_8 = arith.constant dense<0.000000e+00> : vector<128xf32>
    %12 = vector.multi_reduction <add>, %11, %cst_8 [0] : vector<4x128xf32> to vector<128xf32>
    %13 = vector.shape_cast %12 : vector<128xf32> to vector<1x128xf32>
    %c1_i32 = arith.constant 1 : i32
    %14 = vector.broadcast %c1_i32 : i32 to vector<1x128xi32>
    %15 = arith.subi %1, %14 : vector<1x128xi32>
    %16 = vector.broadcast %15 : vector<1x128xi32> to vector<4x128xi32>
    %17 = arith.cmpi eq, %3, %16 : vector<4x128xi32>
    %18 = arith.select %17, %10, %6 : vector<4x128xi1>, vector<4x128xf32>
    %cst_9 = arith.constant dense<0.000000e+00> : vector<128xf32>
    %19 = vector.multi_reduction <add>, %18, %cst_9 [0] : vector<4x128xf32> to vector<128xf32>
    %20 = vector.shape_cast %19 : vector<128xf32> to vector<1x128xf32>
    %c0_i32 = arith.constant 0 : i32
    %21 = vector.broadcast %c0_i32 : i32 to vector<1x128xi32>
    %22 = arith.cmpi eq, %1, %21 : vector<1x128xi32>
    %cst_10 = arith.constant 1.000000e+00 : f32
    %23 = vector.broadcast %cst_10 : f32 to vector<1x128xf32>
    %24 = arith.select %22, %23, %20 : vector<1x128xi1>, vector<1x128xf32>
    %cst_11 = arith.constant 1.000000e-07 : f32
    %25 = vector.broadcast %cst_11 : f32 to vector<1x128xf32>
    %26 = arith.maximumf %24, %25 : vector<1x128xf32>
    %27 = math.log %26 : vector<1x128xf32>
    %cst_12 = arith.constant 1.000000e-07 : f32
    %28 = vector.broadcast %cst_12 : f32 to vector<1x128xf32>
    %29 = arith.maximumf %9, %28 : vector<1x128xf32>
    %30 = math.log %29 : vector<1x128xf32>
    %31 = arith.addf %27, %30 : vector<1x128xf32>
    %cst_13 = arith.constant 1.000000e-07 : f32
    %32 = vector.broadcast %cst_13 : f32 to vector<1x128xf32>
    %33 = arith.maximumf %13, %32 : vector<1x128xf32>
    %34 = math.log %33 : vector<1x128xf32>
    %cst_14 = arith.constant 1.000000e+00 : f32
    %35 = vector.broadcast %cst_14 : f32 to vector<1x128xf32>
    %36 = arith.subf %35, %2 : vector<1x128xf32>
    %cst_15 = arith.constant 0.000000e+00 : f32
    %37 = vector.broadcast %cst_15 : f32 to vector<1x128xf32>
    %38 = arith.subf %37, %36 : vector<1x128xf32>
    %39 = arith.mulf %38, %31 : vector<1x128xf32>
    %cst_16 = arith.constant 0.000000e+00 : f32
    %40 = vector.broadcast %cst_16 : f32 to vector<1x128xf32>
    %41 = arith.subf %40, %2 : vector<1x128xf32>
    %42 = arith.mulf %41, %34 : vector<1x128xf32>
    %43 = arith.addf %42, %39 : vector<1x128xf32>
    %cst_17 = arith.constant 8.500000e-01 : f32
    %44 = vector.broadcast %cst_17 : f32 to vector<1x128xf32>
    %45 = arith.mulf %44, %43 : vector<1x128xf32>
    %cst_18 = arith.constant 1.500000e-01 : f32
    %46 = vector.broadcast %cst_18 : f32 to vector<1x128xf32>
    %47 = arith.mulf %46, %39 : vector<1x128xf32>
    %48 = arith.addf %45, %47 : vector<1x128xf32>
    %c0_19 = arith.constant 0 : index
    %49 = memref.load %arg2[%c0_19] : memref<1xi32, #tpu.memory_space<smem>>
    %c1_i32_20 = arith.constant 1 : i32
    %50 = arith.muli %arg0, %c1_i32_20 : i32
    %51 = arith.addi %50, %arg1 : i32
    %52 = tpu.iota {dimensions = array<i32: 1>} : vector<1x128xi32>
    %c128_i32 = arith.constant 128 : i32
    %53 = arith.muli %51, %c128_i32 : i32
    %54 = vector.broadcast %53 : i32 to vector<1x128xi32>
    %55 = arith.addi %54, %52 : vector<1x128xi32>
    %56 = vector.broadcast %49 : i32 to vector<1x128xi32>
    %57 = arith.cmpi slt, %55, %56 : vector<1x128xi32>
    %cst_21 = arith.constant 0.000000e+00 : f32
    %58 = vector.broadcast %cst_21 : f32 to vector<1x128xf32>
    %59 = arith.select %57, %48, %58 : vector<1x128xi1>, vector<1x128xf32>
    %c0_i32_22 = arith.constant 0 : i32
    %60 = arith.cmpi eq, %arg1, %c0_i32_22 : i32
    %61 = arith.extui %60 : i1 to i32
    %c0_i32_23 = arith.constant 0 : i32
    %62 = arith.cmpi ne, %61, %c0_i32_23 : i32
    scf.if %62 {
      %cst_30 = arith.constant 0.000000e+00 : f32
      %69 = vector.broadcast %cst_30 : f32 to vector<1x128xf32>
      %c0_31 = arith.constant 0 : index
      %c0_32 = arith.constant 0 : index
      %70 = vector.load %arg8[%c0_31, %c0_32] : memref<1x128xf32, #tpu.memory_space<vmem>>, vector<1x128xf32>
      tpu.vector_store %arg8[%c0_31, %c0_32], %69 {strides = array<i32>} : memref<1x128xf32, #tpu.memory_space<vmem>>, vector<1x128xf32>,
    } else {
    }
    %c0_24 = arith.constant 0 : index
    %c0_25 = arith.constant 0 : index
    %63 = vector.load %arg8[%c0_24, %c0_25] : memref<1x128xf32, #tpu.memory_space<vmem>>, vector<1x128xf32>
    %64 = arith.addf %63, %59 : vector<1x128xf32>
    %c0_26 = arith.constant 0 : index
    %c0_27 = arith.constant 0 : index
    %65 = vector.load %arg8[%c0_26, %c0_27] : memref<1x128xf32, #tpu.memory_space<vmem>>, vector<1x128xf32>
    tpu.vector_store %arg8[%c0_26, %c0_27], %64 {strides = array<i32>} : memref<1x128xf32, #tpu.memory_space<vmem>>, vector<1x128xf32>,
    %c0_i32_28 = arith.constant 0 : i32
    %66 = arith.cmpi eq, %arg1, %c0_i32_28 : i32
    %67 = arith.extui %66 : i1 to i32
    %c0_i32_29 = arith.constant 0 : i32
    %68 = arith.cmpi ne, %67, %c0_i32_29 : i32
    scf.if %68 {
      %c0_30 = arith.constant 0 : index
      %c0_31 = arith.constant 0 : index
      %69 = vector.load %arg8[%c0_30, %c0_31] : memref<1x128xf32, #tpu.memory_space<vmem>>, vector<1x128xf32>
      %70 = vector.shape_cast %69 : vector<1x128xf32> to vector<1x1x128xf32>
      %cst_32 = arith.constant dense<0.000000e+00> : vector<1xf32>
      %71 = vector.multi_reduction <add>, %70, %cst_32 [1, 2] : vector<1x1x128xf32> to vector<1xf32>
      %72 = vector.shape_cast %71 : vector<1xf32> to vector<1x1x1xf32>
      %73 = vector.extract %72[0, 0, 0] : f32 from vector<1x1x1xf32>
      %74 = tpu.iota {dimensions = array<i32: 1>} : vector<1x128xi32>
      %c0_i32_33 = arith.constant 0 : i32
      %75 = vector.broadcast %c0_i32_33 : i32 to vector<1x128xi32>
      %76 = arith.cmpi eq, %74, %75 : vector<1x128xi32>
      %cst_34 = arith.constant 0.000000e+00 : f32
      %77 = vector.broadcast %73 : f32 to vector<1x128xf32>
      %78 = vector.broadcast %cst_34 : f32 to vector<1x128xf32>
      %79 = arith.select %76, %77, %78 : vector<1x128xi1>, vector<1x128xf32>
      %c0_35 = arith.constant 0 : index
      %c0_36 = arith.constant 0 : index
      %80 = vector.load %arg7[%c0_35, %c0_36] : memref<1x128xf32, #tpu.memory_space<vmem>>, vector<1x128xf32>
      tpu.vector_store %arg7[%c0_35, %c0_36], %79 {strides = array<i32>} : memref<1x128xf32, #tpu.memory_space<vmem>>, vector<1x128xf32>,
    } else {
    }
    return
  }
  func.func @transform_0(%arg0: i32, %arg1: i32, %arg2: memref<1xi32, #tpu.memory_space<smem>>) -> (i32, i32) {
    %c1_i32 = arith.constant 1 : i32
    %0 = arith.muli %arg0, %c1_i32 : i32
    %1 = arith.addi %0, %arg1 : i32
    %c0_i32 = arith.constant 0 : i32
    %2 = arith.minsi %1, %c0_i32 : i32
    %c0_i32_0 = arith.constant 0 : i32
    %c0_i32_1 = arith.constant 0 : i32
    return %c0_i32_0, %2 : i32, i32
  }
  func.func @transform_1(%arg0: i32, %arg1: i32, %arg2: memref<1xi32, #tpu.memory_space<smem>>) -> (i32, i32) {
    %c1_i32 = arith.constant 1 : i32
    %0 = arith.muli %arg0, %c1_i32 : i32
    %1 = arith.addi %0, %arg1 : i32
    %c0_i32 = arith.constant 0 : i32
    %2 = arith.minsi %1, %c0_i32 : i32
    %c0_i32_0 = arith.constant 0 : i32
    %c0_i32_1 = arith.constant 0 : i32
    return %c0_i32_0, %2 : i32, i32
  }
  func.func @transform_2(%arg0: i32, %arg1: i32, %arg2: memref<1xi32, #tpu.memory_space<smem>>) -> (i32, i32) {
    %c1_i32 = arith.constant 1 : i32
    %0 = arith.muli %arg0, %c1_i32 : i32
    %1 = arith.addi %0, %arg1 : i32
    %c0_i32 = arith.constant 0 : i32
    %2 = arith.minsi %1, %c0_i32 : i32
    %c0_i32_0 = arith.constant 0 : i32
    %c0_i32_1 = arith.constant 0 : i32
    return %c0_i32_0, %2 : i32, i32
  }
  func.func @transform_3(%arg0: i32, %arg1: i32, %arg2: memref<1xi32, #tpu.memory_space<smem>>) -> (i32, i32) {
    %c1_i32 = arith.constant 1 : i32
    %0 = arith.muli %arg0, %c1_i32 : i32
    %1 = arith.addi %0, %arg1 : i32
    %c0_i32 = arith.constant 0 : i32
    %2 = arith.minsi %1, %c0_i32 : i32
    %c0_i32_0 = arith.constant 0 : i32
    %c0_i32_1 = arith.constant 0 : i32
    return %c0_i32_0, %2 : i32, i32
  }
  func.func @transform_4(%arg0: i32, %arg1: i32, %arg2: memref<1xi32, #tpu.memory_space<smem>>) -> (i32, i32) {
    %c0_i32 = arith.constant 0 : i32
    %c0_i32_0 = arith.constant 0 : i32
    return %c0_i32, %arg0 : i32, i32
  }
}

</mosaic_0001>

<bundles_post_ra>
// kernel: tpu_custom_call.1
= control target key start
LH: loop header
LB: loop body
LE: loop exit
PB: predicated region body
PF: predicated region fallthrough
CT: control target
= control target key end

     0   :  { %11 = vsyncpa [#allocation6], 0  ;;  %s373_s0 = inlined_call_operand.<no memory space> [shape: s32[1], index: 0, kind: input, shape index: {}]   ;;  %s374_s1 = inlined_call_operand.hbm [shape: f32[4,8], index: 1, kind: input, shape index: {}]   ;;  %s375_s2 = inlined_call_operand.vmem [shape: f32[4,8], index: 2, kind: input, shape index: {}]   ;;  %s376_s3 = inlined_call_operand.vmem [shape: s32[1,8], index: 3, kind: input, shape index: {}]   ;;  %s377_s4 = inlined_call_operand.vmem [shape: f32[1,8], index: 4, kind: input, shape index: {}]   ;;  %s378_s5 = inlined_call_operand.hbm [shape: f32[1,128], index: 5, kind: output, shape index: {}]  }
   0x1   :  { %12 = vsyncpa [#allocation7], 0  ;;  %s304_s18 = smov [#allocation5]   ;;  %s256_s22 = scalar_lea.hbm %s374_s1, 64 }
   0x2   :  { %s24_s19 = sshll.u32 %s304_s18, 4  ;;  %p257_p0 = scmp.ne.s32.totalorder %s374_s1, %s256_s22  ;;  %s25_s19 = int_to_ptr.vmem [resolvable:$true] %s24_s19 }
   0x3   :  { %p260_p1 = scmp.lt.u32.totalorder %s256_s22, %s374_s1 }
   0x5   :  { %p262_p2 = pnand %p260_p1, %p257_p0 }
   0x7   :  { %265 = shalt.err (!%p262_p2)
}
   0x8   :  { %s266_s27 = scalar_lea.vmem %s25_s19, 64  ;;  %p271_p4 = scmp.lt.s32.totalorder %s25_s19, %s25_s19 }
   0x9   :  { %p267_p3 = scmp.ne.s32.totalorder %s25_s19, %s266_s27  ;;  %p272_p5 = scmp.lt.s32.totalorder %s266_s27, %s266_s27 }
   0xb   :  { %p273_p6 = por %p272_p5, %p271_p4 }
   0xd   :  { %p274_p7 = pnand %p273_p6, %p267_p3 }
   0xf   :  { %277 = shalt.err (!%p274_p7)
}
  0x10   :  { %27 = dma.hbm_to_vmem [thread:$0]  %s374_s1, 64, %s25_s19, [#allocation6]  }
  0x11   :  { %300 = dma.done.wait [#allocation6], 64  }
  0x12   :  { %301 = vsyncadd [#allocation6], 4294967232  ;;  %v118_v0 = vlaneseq  ;;  %v305_v1 = vmov 0.0   ;;  %v116_v4 = vld [vmem:[%s376_s3] sm:$0x1]  ;;  %vm126_vm0 = vcmask 1043456   ;;  %v185_v54 = vstv %s373_s0 }
  0x13   :  { %192 = vst [vmem:[#allocation2] sm:$0x1] %v305_v1  ;;  %v115_v5 = vld [vmem:[#allocation5] sm:$0xf]  ;;  %v244_v7 = vadd.s32 4294967295, %v116_v4  ;;  %vm157_vm3 = vcmp.eq.s32.totalorder %v116_v4, 0 }
  0x14   :  { %v119_v2 = vshrl.u32 %v118_v0, 7  ;;  %v134_v8 = vld [vmem:[%s375_s2] sm:$0xf]  ;;  %v181_v51 = vand.u32 127, %v118_v0  ;;  %vm200_vm5 = vcmask 1040384   ;;  %s306_s0 = smov [#allocation8]  }
  0x15   :  { %v117_v38 = vld [vmem:[%s377_s4] sm:$0x1]  ;;  %s221_s4 = sshll.u32 %s306_s0, 4  ;;  %s222_s4 = int_to_ptr.vmem [resolvable:$true] %s221_s4 }
  0x16   :  { %v122_v3 = vsub.s32 0, %v119_v2  ;;  %v169_v40 = vsub.f32 1.0, %v117_v38  ;;  %v172_v44 = vsub.f32 0.0, %v117_v38  ;;  %vm186_vm4 = vcmp.lt.s32.totalorder %v181_v51, %v185_v54  ;;  %s278_s11 = scalar_lea.vmem %s222_s4, 16  ;;  %s282_s12 = scalar_lea.vmem %s222_s4, 32 }
  0x17   :  { %vm211_vm6 = vcmp.eq.s32.totalorder %v181_v51, 0  ;;  %p279_p8 = scmp.ne.s32.totalorder %s222_s4, %s278_s11  ;;  %p283_p9 = scmp.lt.s32.totalorder %s222_s4, %s222_s4 }
  0x18   :  { %v123_v6 = vrot.slane %v116_v4, %v122_v3  ;;  %v147_v9 = vrot.slane %v244_v7, %v122_v3  ;;  %v170_v47 = vsub.f32 0.0, %v169_v40  ;;  %p284_p10 = scmp.lt.s32.totalorder %s282_s12, %s278_s11 }
  0x1a   :  { %vm124_vm1 = vcmp.eq.s32.totalorder %v119_v2, %v123_v6  ;;  %vm148_vm2 = vcmp.eq.s32.totalorder %v119_v2, %v147_v9  ;;  %v193_v57 = vld [vmem:[#allocation2] sm:$0x1]  ;;  %p285_p11 = por %p284_p10, %p283_p9 }
  0x1b   :  { %v125_v10 = vsel %vm124_vm1, %v115_v5, 0.0  ;;  %v135_v11 = vsel %vm124_vm1, %v134_v8, 0.0  ;;  %v149_v16 = vsel %vm148_vm2, %v134_v8, 0.0 }
  0x1c   :  { %v127_v12 = vsel %vm126_vm0, %v125_v10, 0.0  ;;  %v136_v13 = vsel %vm126_vm0, %v135_v11, 0.0  ;;  %v150_v17 = vsel %vm126_vm0, %v149_v16, 0.0  ;;  %p286_p12 = pnand %p285_p11, %p279_p8 }
  0x1d   :  { %v128_v14 = vrot.slane %v127_v12, 4  ;;  %v137_v15 = vrot.slane %v136_v13, 4  ;;  %v151_v20 = vrot.slane %v150_v17, 4 }
  0x1f   :  { %v129_v18 = vadd.f32 %v128_v14, %v127_v12  ;;  %v138_v19 = vadd.f32 %v137_v15, %v136_v13  ;;  %v152_v23 = vadd.f32 %v151_v20, %v150_v17 }
  0x21   :  { %v130_v21 = vrot.slane %v129_v18, 2  ;;  %v139_v22 = vrot.slane %v138_v19, 2  ;;  %v153_v26 = vrot.slane %v152_v23, 2 }
  0x23   :  { %v131_v24 = vadd.f32 %v130_v21, %v129_v18  ;;  %v140_v25 = vadd.f32 %v139_v22, %v138_v19  ;;  %v154_v29 = vadd.f32 %v153_v26, %v152_v23 }
  0x25   :  { %v132_v27 = vrot.slane %v131_v24, 1  ;;  %v141_v28 = vrot.slane %v140_v25, 1  ;;  %v155_v32 = vrot.slane %v154_v29, 1 }
  0x27   :  { %v133_v30 = vadd.f32 %v132_v27, %v131_v24  ;;  %v142_v31 = vadd.f32 %v141_v28, %v140_v25  ;;  %v156_v33 = vadd.f32 %v155_v32, %v154_v29 }
  0x29   :  { %v162_v34 = vmax.f32 %v133_v30, 1e-07  ;;  %v166_v35 = vmax.f32 %v142_v31, 1e-07  ;;  %v158_v36 = vsel %vm157_vm3, 1.0, %v156_v33 }
  0x2a   :  { %v159_v37 = vmax.f32 %v158_v36, 1e-07 }
  0x2b   :  { %250 = vlog2.f32 %v162_v34 }
  0x2c   :  { %252 = vlog2.f32 %v166_v35 }
  0x2d   :  { %254 = vlog2.f32 %v159_v37 }
  0x35   :  { %v251_v39 = vpop.eup %250 }
  0x36   :  { %v253_v41 = vpop.eup %252  ;;  %v164_v42 = vmul.f32 0.6931472, %v251_v39 }
  0x37   :  { %v168_v43 = vmul.f32 0.6931472, %v253_v41  ;;  %v255_v45 = vpop.eup %254 }
  0x38   :  { %v161_v46 = vmul.f32 0.6931472, %v255_v45 }
  0x39   :  { %v173_v49 = vmul.f32 %v172_v44, %v168_v43 }
  0x3a   :  { %v165_v48 = vadd.f32 %v164_v42, %v161_v46 }
  0x3c   :  { %v171_v50 = vmul.f32 %v170_v47, %v165_v48 }
  0x3e   :  { %v174_v52 = vadd.f32 %v173_v49, %v171_v50  ;;  %v176_v53 = vmul.f32 0.15, %v171_v50 }
  0x40   :  { %v175_v55 = vmul.f32 0.85, %v174_v52 }
  0x42   :  { %v177_v56 = vadd.f32 %v176_v53, %v175_v55 }
  0x44   :  { %v187_v58 = vsel %vm186_vm4, %v177_v56, 0.0 }
  0x45   :  { %v194_v59 = vadd.f32 %v193_v57, %v187_v58 }
  0x47   :  { %195 = vst [vmem:[#allocation2] sm:$0x1] %v194_v59 }
  0x4e   :  { %v199_v60 = vld [vmem:[#allocation2] sm:$0x1] }
  0x4f   :  { %v201_v61 = vsel %vm200_vm5, %v199_v60, 0.0 }
  0x50   :  { %202 = vadd.xlane.f32.xlu0 %v201_v61 }
  0xdd   :  { %v203_v62 = vpop.xlane.xlu0 %202 }
  0xde   :  { %v204_v63 = vrot.slane %v203_v62, 4 }
  0xe0   :  { %v205_v0 = vadd.f32 %v204_v63, %v203_v62 }
  0xe2   :  { %v206_v1 = vrot.slane %v205_v0, 2 }
  0xe4   :  { %v207_v2 = vadd.f32 %v206_v1, %v205_v0 }
  0xe6   :  { %v208_v3 = vrot.slane %v207_v2, 1 }
  0xe8   :  { %v209_v4 = vadd.f32 %v208_v3, %v207_v2 }
  0xea   :  { %245 = vpush %v209_v4 }
 0x11b   :  { %s246_s10 = spop %245 }
 0x11c   :  { %v212_v5 = vstv %s246_s10 }
 0x11d   :  { %v213_v6 = vsel %vm211_vm6, %v212_v5, 0.0 }
 0x11e   :  { %214 = vst [vmem:[#allocation8] sm:$0x1] %v213_v6 }
 0x11f   :  { %289 = shalt.err (!%p286_p12)
}
 0x120   :  { %s290_s15 = scalar_lea.hbm %s378_s5, 16 }
 0x121   :  { %p291_p13 = scmp.ne.s32.totalorder %s378_s5, %s290_s15  ;;  %p294_p0 = scmp.lt.u32.totalorder %s290_s15, %s378_s5 }
 0x123   :  { %p296_p1 = pnand %p294_p0, %p291_p13 }
 0x125   :  { %299 = shalt.err (!%p296_p1)
}
 0x126   :  { %224 = dma.vmem_to_hbm [thread:$0]  %s222_s4, 16, %s378_s5, [#allocation7]  }
 0x127   :  { %302 = dma.done.wait [#allocation7], 16  }
 0x128   :  { %303 = vsyncadd [#allocation7], 4294967280 }
 0x129   :  { %228 = vsyncpa [#allocation6], 1 }
 0x12a   :  { %229 = vsyncpa [#allocation7], 1 }

</bundles_post_ra>
